<compile_context>
chip_gen: v7x
topology: tpu7x:2x2x1
jax: 0.10.0
libtpu: 0.0.40
codegen_flags: <defaults>
</compile_context>

<pallas_src>
import functools

import jax
import jax.numpy as jnp
from jax.experimental import pallas as pl
from jax.experimental.pallas import tpu as pltpu


def _fused_mlp_kernel(x_ref, w1_ref, w2_ref, w3_ref, w4_ref, o_ref, *, eps):
    """Fused fc1..fc4 + bn1..bn4 (+ ReLU on the first three stages)."""

    def layer(h_f32, w_ref, apply_relu):
        # h_f32: (M, K) f32, w_ref: (K, N) bf16  ->  z: (M, N) f32.
        # bf16 operands feed the MXU natively; accumulate in f32.
        z = jnp.dot(
            h_f32.astype(jnp.bfloat16),
            w_ref[...],
            preferred_element_type=jnp.float32,
        )
        # BatchNorm1d, training mode, affine=False: per-feature batch mean and
        # biased variance.  Single traversal: E[z], E[z^2], var = E[z^2]-E[z]^2.
        inv_m = 1.0 / z.shape[0]
        mean = jnp.sum(z, axis=0, keepdims=True) * inv_m
        mean_sq = jnp.sum(z * z, axis=0, keepdims=True) * inv_m
        var = mean_sq - mean * mean
        y = (z - mean) * jax.lax.rsqrt(var + eps)
        if apply_relu:
            y = jnp.maximum(y, 0.0)
        return y

    h = x_ref[...].astype(jnp.float32)
    h = layer(h, w1_ref, True)   # fc1 -> bn1 -> relu
    h = layer(h, w2_ref, True)   # fc2 -> bn2 -> relu
    h = layer(h, w3_ref, True)   # fc3 -> bn3 -> relu
    h = layer(h, w4_ref, False)  # fc4 -> bn4 (no relu)
    o_ref[...] = h.astype(o_ref.dtype)


def prepare_params(params):
    """One-time layout/dtype prep (hoisted out of the forward path).

    Torch-convention (out_features, in_features) f32 weights -> (in, out) bf16
    so the kernel's dot consumes them without any in-kernel transpose.
    """
    return [jnp.asarray(w, jnp.float32).T.astype(jnp.bfloat16) for w in params]


def binary_connect_forward(x, wts, in_features, eps=1e-4):
    """Full BinaryConnect forward in one fused Pallas kernel.

    `x` may have any leading shape; it is flattened to (-1, in_features) just
    like `x.view(-1, in_features)`.  `wts` are the prepared (in, out) bf16
    weights from `prepare_params`.
    """
    x2d = x.reshape(-1, in_features).astype(jnp.float32)
    m, k = x2d.shape

    dims = [k] + [w.shape[1] for w in wts]  # [K, N1, N2, N3, N4]
    n_out = dims[-1]
    max_n = max(dims)

    # Scheduler hint: matmul flops + the HBM traffic of x, weights, output.
    flops = 2 * m * sum(a * b for a, b in zip(dims[:-1], dims[1:]))
    operand_bytes = 4 * m * k + 2 * sum(int(w.size) for w in wts) + 4 * m * n_out
    cost = pl.CostEstimate(
        flops=flops, transcendentals=0, bytes_accessed=operand_bytes
    )

    # Explicit scoped-VMEM budget: single-buffered operands + a handful of
    # (M, max_n) f32 activation temporaries + margin.  (Defaults are only
    # 16/32 MiB, too small once num_units grows.)
    vmem_bytes = max(
        int(1.25 * operand_bytes) + 8 * 4 * m * max_n + (4 << 20),
        32 << 20,
    )

    kernel = functools.partial(_fused_mlp_kernel, eps=eps)
    vmem_spec = pl.BlockSpec(memory_space=pltpu.MemorySpace.VMEM)

    # Single-shot kernel: no grid, no pipelining machinery, every operand is a
    # whole-array VMEM block (single-buffered).
    return pl.pallas_call(
        kernel,
        out_shape=jax.ShapeDtypeStruct((m, n_out), jnp.float32),
        in_specs=[vmem_spec] * 5,
        out_specs=vmem_spec,
        compiler_params=pltpu.CompilerParams(vmem_limit_bytes=vmem_bytes),
        cost_estimate=cost,
    )(x2d, *wts)


def init_params(key, in_features, num_units, out_features):
    """Deterministic init mimicking torch.nn.Linear default (U[-1/sqrt(fan_in), +])."""
    shapes = [
        (num_units, in_features),
        (num_units, num_units),
        (num_units, num_units),
        (out_features, num_units),
    ]
    keys = jax.random.split(key, len(shapes))
    params = []
    for kk, (fan_out, fan_in) in zip(keys, shapes):
        bound = 1.0 / (fan_in ** 0.5)
        params.append(
            jax.random.uniform(kk, (fan_out, fan_in), jnp.float32, -bound, bound)
        )
    return params


if __name__ == "__main__":
    # Small shapes consistent with the module's forward:
    #   input (2, 4, 128) -> view(-1, 128)  =>  batch 8, in_features 128
    in_features = 128
    num_units = 256
    out_features = 128
    eps = 1e-4  # module default (NOT torch BatchNorm1d's 1e-5)

    key = jax.random.PRNGKey(0)
    kx, kp = jax.random.split(key)
    x = jax.random.normal(kx, (2, 4, in_features), jnp.float32)
    params = init_params(kp, in_features, num_units, out_features)

    # One-time weight layout/dtype preparation (hoisted out of the forward).
    wts = prepare_params(params)

    out = binary_connect_forward(x, wts, in_features, eps=eps)
    out = jax.block_until_ready(out)

    # Sanity check vs a pure-JAX reference using the same MXU dtype (bf16 dot
    # operands, f32 accumulate) and textbook two-pass BatchNorm math.
    def ref_layer(h, w_t, relu):
        z = jnp.dot(h.astype(jnp.bfloat16), w_t, preferred_element_type=jnp.float32)
        mu = z.mean(axis=0, keepdims=True)
        var = ((z - mu) ** 2).mean(axis=0, keepdims=True)
        y = (z - mu) / jnp.sqrt(var + eps)
        return jnp.maximum(y, 0.0) if relu else y

    h = x.reshape(-1, in_features).astype(jnp.float32)
    for w_t, relu in zip(wts, (True, True, True, False)):
        h = ref_layer(h, w_t, relu)

    assert out.shape == (8, out_features)
    assert jnp.max(jnp.abs(out - h)) < 1e-2, "mismatch vs reference"

    print("KERNEL_OK")
</pallas_src>

<mosaic_0001>
module attributes {stable_mosaic.version = 11 : i64} {
  func.func @_fused_mlp_kernel(%arg0: memref<8x128xf32, #tpu.memory_space<vmem>>, %arg1: memref<128x256xbf16, #tpu.memory_space<vmem>>, %arg2: memref<256x256xbf16, #tpu.memory_space<vmem>>, %arg3: memref<256x256xbf16, #tpu.memory_space<vmem>>, %arg4: memref<256x128xbf16, #tpu.memory_space<vmem>>, %arg5: memref<8x128xf32, #tpu.memory_space<vmem>>) attributes {dimension_semantics = [], scalar_prefetch = 0 : i64, scratch_operands = 0 : i64, tpu.core_type = #tpu.core_type<tc>} {
    %c0 = arith.constant 0 : index
    %c0_0 = arith.constant 0 : index
    %0 = vector.load %arg0[%c0, %c0_0] : memref<8x128xf32, #tpu.memory_space<vmem>>, vector<8x128xf32>
    %1 = arith.truncf %0 : vector<8x128xf32> to vector<8x128xbf16>
    %c0_1 = arith.constant 0 : index
    %c0_2 = arith.constant 0 : index
    %2 = vector.load %arg1[%c0_1, %c0_2] : memref<128x256xbf16, #tpu.memory_space<vmem>>, vector<128x256xbf16>
    %cst = arith.constant dense<0.000000e+00> : vector<8x256xf32>
    %3 = tpu.matmul %1, %2, %cst {dimension_numbers = #tpu.dot_dimension_numbers<[1], [0], [0], [1], [0, 0, 1, 1], [], []>} : vector<8x128xbf16>, vector<128x256xbf16>, vector<8x256xf32> -> vector<8x256xf32>
    %cst_3 = arith.constant dense<0.000000e+00> : vector<256xf32>
    %4 = vector.multi_reduction <add>, %3, %cst_3 [0] : vector<8x256xf32> to vector<256xf32>
    %5 = vector.shape_cast %4 : vector<256xf32> to vector<1x256xf32>
    %cst_4 = arith.constant 1.250000e-01 : f32
    %6 = vector.broadcast %cst_4 : f32 to vector<1x256xf32>
    %7 = arith.mulf %5, %6 : vector<1x256xf32>
    %8 = arith.mulf %3, %3 : vector<8x256xf32>
    %cst_5 = arith.constant dense<0.000000e+00> : vector<256xf32>
    %9 = vector.multi_reduction <add>, %8, %cst_5 [0] : vector<8x256xf32> to vector<256xf32>
    %10 = vector.shape_cast %9 : vector<256xf32> to vector<1x256xf32>
    %cst_6 = arith.constant 1.250000e-01 : f32
    %11 = vector.broadcast %cst_6 : f32 to vector<1x256xf32>
    %12 = arith.mulf %10, %11 : vector<1x256xf32>
    %13 = arith.mulf %7, %7 : vector<1x256xf32>
    %14 = arith.subf %12, %13 : vector<1x256xf32>
    %15 = vector.broadcast %7 : vector<1x256xf32> to vector<8x256xf32>
    %16 = arith.subf %3, %15 : vector<8x256xf32>
    %cst_7 = arith.constant 9.99999974E-5 : f32
    %17 = vector.broadcast %cst_7 : f32 to vector<1x256xf32>
    %18 = arith.addf %14, %17 : vector<1x256xf32>
    %19 = math.rsqrt %18 : vector<1x256xf32>
    %20 = vector.broadcast %19 : vector<1x256xf32> to vector<8x256xf32>
    %21 = arith.mulf %16, %20 : vector<8x256xf32>
    %cst_8 = arith.constant 0.000000e+00 : f32
    %22 = vector.broadcast %cst_8 : f32 to vector<8x256xf32>
    %23 = arith.maximumf %21, %22 : vector<8x256xf32>
    %24 = arith.truncf %23 : vector<8x256xf32> to vector<8x256xbf16>
    %c0_9 = arith.constant 0 : index
    %c0_10 = arith.constant 0 : index
    %25 = vector.load %arg2[%c0_9, %c0_10] : memref<256x256xbf16, #tpu.memory_space<vmem>>, vector<256x256xbf16>
    %cst_11 = arith.constant dense<0.000000e+00> : vector<8x256xf32>
    %26 = tpu.matmul %24, %25, %cst_11 {dimension_numbers = #tpu.dot_dimension_numbers<[1], [0], [0], [1], [0, 0, 1, 1], [], []>} : vector<8x256xbf16>, vector<256x256xbf16>, vector<8x256xf32> -> vector<8x256xf32>
    %cst_12 = arith.constant dense<0.000000e+00> : vector<256xf32>
    %27 = vector.multi_reduction <add>, %26, %cst_12 [0] : vector<8x256xf32> to vector<256xf32>
    %28 = vector.shape_cast %27 : vector<256xf32> to vector<1x256xf32>
    %cst_13 = arith.constant 1.250000e-01 : f32
    %29 = vector.broadcast %cst_13 : f32 to vector<1x256xf32>
    %30 = arith.mulf %28, %29 : vector<1x256xf32>
    %31 = arith.mulf %26, %26 : vector<8x256xf32>
    %cst_14 = arith.constant dense<0.000000e+00> : vector<256xf32>
    %32 = vector.multi_reduction <add>, %31, %cst_14 [0] : vector<8x256xf32> to vector<256xf32>
    %33 = vector.shape_cast %32 : vector<256xf32> to vector<1x256xf32>
    %cst_15 = arith.constant 1.250000e-01 : f32
    %34 = vector.broadcast %cst_15 : f32 to vector<1x256xf32>
    %35 = arith.mulf %33, %34 : vector<1x256xf32>
    %36 = arith.mulf %30, %30 : vector<1x256xf32>
    %37 = arith.subf %35, %36 : vector<1x256xf32>
    %38 = vector.broadcast %30 : vector<1x256xf32> to vector<8x256xf32>
    %39 = arith.subf %26, %38 : vector<8x256xf32>
    %cst_16 = arith.constant 9.99999974E-5 : f32
    %40 = vector.broadcast %cst_16 : f32 to vector<1x256xf32>
    %41 = arith.addf %37, %40 : vector<1x256xf32>
    %42 = math.rsqrt %41 : vector<1x256xf32>
    %43 = vector.broadcast %42 : vector<1x256xf32> to vector<8x256xf32>
    %44 = arith.mulf %39, %43 : vector<8x256xf32>
    %cst_17 = arith.constant 0.000000e+00 : f32
    %45 = vector.broadcast %cst_17 : f32 to vector<8x256xf32>
    %46 = arith.maximumf %44, %45 : vector<8x256xf32>
    %47 = arith.truncf %46 : vector<8x256xf32> to vector<8x256xbf16>
    %c0_18 = arith.constant 0 : index
    %c0_19 = arith.constant 0 : index
    %48 = vector.load %arg3[%c0_18, %c0_19] : memref<256x256xbf16, #tpu.memory_space<vmem>>, vector<256x256xbf16>
    %cst_20 = arith.constant dense<0.000000e+00> : vector<8x256xf32>
    %49 = tpu.matmul %47, %48, %cst_20 {dimension_numbers = #tpu.dot_dimension_numbers<[1], [0], [0], [1], [0, 0, 1, 1], [], []>} : vector<8x256xbf16>, vector<256x256xbf16>, vector<8x256xf32> -> vector<8x256xf32>
    %cst_21 = arith.constant dense<0.000000e+00> : vector<256xf32>
    %50 = vector.multi_reduction <add>, %49, %cst_21 [0] : vector<8x256xf32> to vector<256xf32>
    %51 = vector.shape_cast %50 : vector<256xf32> to vector<1x256xf32>
    %cst_22 = arith.constant 1.250000e-01 : f32
    %52 = vector.broadcast %cst_22 : f32 to vector<1x256xf32>
    %53 = arith.mulf %51, %52 : vector<1x256xf32>
    %54 = arith.mulf %49, %49 : vector<8x256xf32>
    %cst_23 = arith.constant dense<0.000000e+00> : vector<256xf32>
    %55 = vector.multi_reduction <add>, %54, %cst_23 [0] : vector<8x256xf32> to vector<256xf32>
    %56 = vector.shape_cast %55 : vector<256xf32> to vector<1x256xf32>
    %cst_24 = arith.constant 1.250000e-01 : f32
    %57 = vector.broadcast %cst_24 : f32 to vector<1x256xf32>
    %58 = arith.mulf %56, %57 : vector<1x256xf32>
    %59 = arith.mulf %53, %53 : vector<1x256xf32>
    %60 = arith.subf %58, %59 : vector<1x256xf32>
    %61 = vector.broadcast %53 : vector<1x256xf32> to vector<8x256xf32>
    %62 = arith.subf %49, %61 : vector<8x256xf32>
    %cst_25 = arith.constant 9.99999974E-5 : f32
    %63 = vector.broadcast %cst_25 : f32 to vector<1x256xf32>
    %64 = arith.addf %60, %63 : vector<1x256xf32>
    %65 = math.rsqrt %64 : vector<1x256xf32>
    %66 = vector.broadcast %65 : vector<1x256xf32> to vector<8x256xf32>
    %67 = arith.mulf %62, %66 : vector<8x256xf32>
    %cst_26 = arith.constant 0.000000e+00 : f32
    %68 = vector.broadcast %cst_26 : f32 to vector<8x256xf32>
    %69 = arith.maximumf %67, %68 : vector<8x256xf32>
    %70 = arith.truncf %69 : vector<8x256xf32> to vector<8x256xbf16>
    %c0_27 = arith.constant 0 : index
    %c0_28 = arith.constant 0 : index
    %71 = vector.load %arg4[%c0_27, %c0_28] : memref<256x128xbf16, #tpu.memory_space<vmem>>, vector<256x128xbf16>
    %cst_29 = arith.constant dense<0.000000e+00> : vector<8x128xf32>
    %72 = tpu.matmul %70, %71, %cst_29 {dimension_numbers = #tpu.dot_dimension_numbers<[1], [0], [0], [1], [0, 0, 1, 1], [], []>} : vector<8x256xbf16>, vector<256x128xbf16>, vector<8x128xf32> -> vector<8x128xf32>
    %cst_30 = arith.constant dense<0.000000e+00> : vector<128xf32>
    %73 = vector.multi_reduction <add>, %72, %cst_30 [0] : vector<8x128xf32> to vector<128xf32>
    %74 = vector.shape_cast %73 : vector<128xf32> to vector<1x128xf32>
    %cst_31 = arith.constant 1.250000e-01 : f32
    %75 = vector.broadcast %cst_31 : f32 to vector<1x128xf32>
    %76 = arith.mulf %74, %75 : vector<1x128xf32>
    %77 = arith.mulf %72, %72 : vector<8x128xf32>
    %cst_32 = arith.constant dense<0.000000e+00> : vector<128xf32>
    %78 = vector.multi_reduction <add>, %77, %cst_32 [0] : vector<8x128xf32> to vector<128xf32>
    %79 = vector.shape_cast %78 : vector<128xf32> to vector<1x128xf32>
    %cst_33 = arith.constant 1.250000e-01 : f32
    %80 = vector.broadcast %cst_33 : f32 to vector<1x128xf32>
    %81 = arith.mulf %79, %80 : vector<1x128xf32>
    %82 = arith.mulf %76, %76 : vector<1x128xf32>
    %83 = arith.subf %81, %82 : vector<1x128xf32>
    %84 = vector.broadcast %76 : vector<1x128xf32> to vector<8x128xf32>
    %85 = arith.subf %72, %84 : vector<8x128xf32>
    %cst_34 = arith.constant 9.99999974E-5 : f32
    %86 = vector.broadcast %cst_34 : f32 to vector<1x128xf32>
    %87 = arith.addf %83, %86 : vector<1x128xf32>
    %88 = math.rsqrt %87 : vector<1x128xf32>
    %89 = vector.broadcast %88 : vector<1x128xf32> to vector<8x128xf32>
    %90 = arith.mulf %85, %89 : vector<8x128xf32>
    %c0_35 = arith.constant 0 : index
    %c0_36 = arith.constant 0 : index
    %91 = vector.load %arg5[%c0_35, %c0_36] : memref<8x128xf32, #tpu.memory_space<vmem>>, vector<8x128xf32>
    tpu.vector_store %arg5[%c0_35, %c0_36], %90 {strides = array<i32>} : memref<8x128xf32, #tpu.memory_space<vmem>>, vector<8x128xf32>,
    return
  }
}

</mosaic_0001>

<bundles_post_ra>
// kernel: tpu_custom_call.1
= control target key start
LH: loop header
LB: loop body
LE: loop exit
PB: predicated region body
PF: predicated region fallthrough
CT: control target
= control target key end

     0   :  { %10 = vsyncpa [#allocation3], 0  ;;  %s1579_s0 = inlined_call_operand.hbm [shape: f32[8,128], index: 0, kind: input, shape index: {}]   ;;  %s1580_s1 = inlined_call_operand.hbm [shape: bf16[128,256], index: 1, kind: input, shape index: {}]   ;;  %s1581_s2 = inlined_call_operand.hbm [shape: bf16[256,256], index: 2, kind: input, shape index: {}]   ;;  %s1582_s3 = inlined_call_operand.hbm [shape: bf16[256,256], index: 3, kind: input, shape index: {}]   ;;  %s1583_s4 = inlined_call_operand.hbm [shape: bf16[256,128], index: 4, kind: input, shape index: {}]   ;;  %s1584_s5 = inlined_call_operand.hbm [shape: f32[8,128], index: 5, kind: output, shape index: {}]  }
   0x1   :  { %11 = vsyncpa [#allocation6], 0 }
   0x2   :  { %12 = vsyncpa [#allocation9], 0 }
   0x3   :  { %13 = vsyncpa [#allocation4], 0  ;;  %s1457_s18 = smov [#allocation5]   ;;  %s1317_s22 = scalar_lea.hbm %s1580_s1, 2048 }
   0x4   :  { %s29_s19 = sshll.u32 %s1457_s18, 4  ;;  %p1318_p0 = scmp.ne.s32.totalorder %s1580_s1, %s1317_s22  ;;  %s30_s19 = int_to_ptr.vmem [resolvable:$true] %s29_s19 }
   0x5   :  { %p1321_p1 = scmp.lt.u32.totalorder %s1317_s22, %s1580_s1 }
   0x7   :  { %p1323_p2 = pnand %p1321_p1, %p1318_p0 }
   0x9   :  { %1326 = shalt.err (!%p1323_p2)
}
   0xa   :  { %s1327_s27 = scalar_lea.vmem %s30_s19, 2048  ;;  %p1332_p4 = scmp.lt.s32.totalorder %s30_s19, %s30_s19 }
   0xb   :  { %p1328_p3 = scmp.ne.s32.totalorder %s30_s19, %s1327_s27  ;;  %p1333_p5 = scmp.lt.s32.totalorder %s1327_s27, %s1327_s27 }
   0xd   :  { %p1334_p6 = por %p1333_p5, %p1332_p4 }
   0xf   :  { %p1335_p7 = pnand %p1334_p6, %p1328_p3 }
  0x11   :  { %1338 = shalt.err (!%p1335_p7)
}
  0x12   :  { %s1458_s28 = smov 128   ;;  %s1459_s29 = smov 8  }
  0x13   :  { %35 = dma.hbm_to_vmem [thread:$0]  %s1580_s1, 2048, %s30_s19, [#allocation6], %s1458_s28, %s1458_s28, %s1459_s29  }
  0x14   :  { %s1460_s7 = smov [#allocation8]   ;;  %s1461_s9 = smov [#allocation2]  }
  0x15   :  { %s53_s8 = sshll.u32 %s1460_s7, 4  ;;  %s20_s10 = sshll.u32 %s1461_s9, 4  ;;  %s54_s8 = int_to_ptr.vmem [resolvable:$true] %s53_s8  ;;  %s21_s10 = int_to_ptr.vmem [resolvable:$true] %s20_s10 }
  0x16   :  { %s1339_s13 = scalar_lea.hbm %s1582_s3, 4096 }
  0x17   :  { %p1340_p8 = scmp.ne.s32.totalorder %s1582_s3, %s1339_s13  ;;  %p1343_p9 = scmp.lt.u32.totalorder %s1339_s13, %s1582_s3 }
  0x19   :  { %p1345_p10 = pnand %p1343_p9, %p1340_p8 }
  0x1b   :  { %1348 = shalt.err (!%p1345_p10)
}
  0x1c   :  { %s1349_s1 = scalar_lea.vmem %s54_s8, 4096  ;;  %p1354_p12 = scmp.lt.s32.totalorder %s54_s8, %s54_s8 }
  0x1d   :  { %p1350_p11 = scmp.ne.s32.totalorder %s54_s8, %s1349_s1  ;;  %p1355_p13 = scmp.lt.s32.totalorder %s1349_s1, %s1349_s1 }
  0x1f   :  { %p1356_p0 = por %p1355_p13, %p1354_p12 }
  0x21   :  { %p1357_p1 = pnand %p1356_p0, %p1350_p11 }
  0x23   :  { %1360 = shalt.err (!%p1357_p1)
}
  0x24   :  { %59 = dma.hbm_to_vmem [thread:$0]  %s1582_s3, 4096, %s54_s8, [#allocation9], %s1458_s28, %s1458_s28, %s1459_s29  }
  0x25   :  { %s1361_s22 = scalar_lea.hbm %s1579_s0, 128 }
  0x26   :  { %p1362_p2 = scmp.ne.s32.totalorder %s1579_s0, %s1361_s22  ;;  %p1365_p3 = scmp.lt.u32.totalorder %s1361_s22, %s1579_s0 }
  0x28   :  { %p1367_p4 = pnand %p1365_p3, %p1362_p2 }
  0x2a   :  { %1370 = shalt.err (!%p1367_p4)
}
  0x2b   :  { %s1371_s27 = scalar_lea.vmem %s21_s10, 128  ;;  %p1376_p6 = scmp.lt.s32.totalorder %s21_s10, %s21_s10 }
  0x2c   :  { %p1372_p5 = scmp.ne.s32.totalorder %s21_s10, %s1371_s27  ;;  %p1377_p7 = scmp.lt.s32.totalorder %s1371_s27, %s1371_s27 }
  0x2e   :  { %p1378_p8 = por %p1377_p7, %p1376_p6 }
  0x30   :  { %p1379_p9 = pnand %p1378_p8, %p1372_p5 }
  0x32   :  { %1382 = shalt.err (!%p1379_p9)
}
  0x33   :  { %23 = dma.hbm_to_vmem [thread:$0]  %s1579_s0, 128, %s21_s10, [#allocation3]  }
  0x34   :  { %s1462_s6 = smov [#allocation7]   ;;  %s1463_s8 = smov [#allocation10]  }
  0x35   :  { %s41_s7 = sshll.u32 %s1462_s6, 4  ;;  %s65_s9 = sshll.u32 %s1463_s8, 4  ;;  %s42_s7 = int_to_ptr.vmem [resolvable:$true] %s41_s7  ;;  %s66_s9 = int_to_ptr.vmem [resolvable:$true] %s65_s9 }
  0x36   :  { %s1383_s13 = scalar_lea.hbm %s1581_s2, 4096 }
  0x37   :  { %p1384_p10 = scmp.ne.s32.totalorder %s1581_s2, %s1383_s13  ;;  %p1387_p11 = scmp.lt.u32.totalorder %s1383_s13, %s1581_s2 }
  0x39   :  { %p1389_p12 = pnand %p1387_p11, %p1384_p10 }
  0x3b   :  { %1392 = shalt.err (!%p1389_p12)
}
  0x3c   :  { %s1393_s0 = scalar_lea.vmem %s42_s7, 4096  ;;  %p1398_p0 = scmp.lt.s32.totalorder %s42_s7, %s42_s7 }
  0x3d   :  { %p1394_p13 = scmp.ne.s32.totalorder %s42_s7, %s1393_s0  ;;  %p1399_p1 = scmp.lt.s32.totalorder %s1393_s0, %s1393_s0 }
  0x3f   :  { %p1400_p2 = por %p1399_p1, %p1398_p0 }
  0x41   :  { %p1401_p3 = pnand %p1400_p2, %p1394_p13 }
  0x43   :  { %1404 = shalt.err (!%p1401_p3)
}
  0x44   :  { %47 = dma.hbm_to_vmem [thread:$0]  %s1581_s2, 4096, %s42_s7, [#allocation6], %s1458_s28, %s1458_s28, %s1459_s29  }
  0x45   :  { %s1405_s20 = scalar_lea.hbm %s1583_s4, 2048 }
  0x46   :  { %p1406_p4 = scmp.ne.s32.totalorder %s1583_s4, %s1405_s20  ;;  %p1409_p5 = scmp.lt.u32.totalorder %s1405_s20, %s1583_s4 }
  0x48   :  { %p1411_p6 = pnand %p1409_p5, %p1406_p4 }
  0x4a   :  { %1414 = shalt.err (!%p1411_p6)
}
  0x4b   :  { %s1415_s25 = scalar_lea.vmem %s66_s9, 2048  ;;  %p1420_p8 = scmp.lt.s32.totalorder %s66_s9, %s66_s9 }
  0x4c   :  { %p1416_p7 = scmp.ne.s32.totalorder %s66_s9, %s1415_s25  ;;  %p1421_p9 = scmp.lt.s32.totalorder %s1415_s25, %s1415_s25 }
  0x4e   :  { %p1422_p10 = por %p1421_p9, %p1420_p8 }
  0x50   :  { %p1423_p11 = pnand %p1422_p10, %p1416_p7 }
  0x52   :  { %1426 = shalt.err (!%p1423_p11)
}
  0x53   :  { %s1464_s2 = smov 64   ;;  %s1465_s28 = smov 4  }
  0x54   :  { %71 = dma.hbm_to_vmem [thread:$0]  %s1583_s4, 2048, %s66_s9, [#allocation9], %s1464_s2, %s1464_s2, %s1465_s28  }
  0x55   :  { %1449 = dma.done.wait [#allocation3], 128  }
  0x56   :  { %1450 = vsyncadd [#allocation3], 4294967168 }
  0x57   :  { %1451 = dma.done.wait [#allocation6], 6144  }
  0x58   :  { %1452 = vsyncadd [#allocation6], 4294961152 }
  0x59   :  { %1453 = dma.done.wait [#allocation9], 6144  }
  0x5a   :  { %1454 = vsyncadd [#allocation9], 4294961152  ;;  %v1466_v0 = vmov 0   ;;  %v1167_v1 = vld [vmem:[#allocation5 + $0x4] ss:$8 sps:$4 sm:$0xff]   ;;  %v88_v27 = vld [vmem:[#allocation2] sm:$0xff] }
  0x5b   :  { %218 = vmatprep.mubr.bf16.mxu0 %v1466_v0  ;;  %v1169_v2 = vld [vmem:[#allocation5] ss:$8 sps:$4 sm:$0xff]   ;;  %186 = vmatprep.subr.bf16.mxu0 %v1167_v1  ;;  %v1170_v3 = vld [vmem:[#allocation5 + $0x14] ss:$8 sps:$4 sm:$0xff]   ;;  %v1172_v4 = vld [vmem:[#allocation5 + $0x10] ss:$8 sps:$4 sm:$0xff]   ;;  %v89_v30 = vpack.c.bf16 %v88_v27, %v88_v27 }
  0x5c   :  { %187 = vmatpush1.bf16.msra.mxu0 %v1169_v2  ;;  %v1173_v5 = vld [vmem:[#allocation5 + $0x24] ss:$8 sps:$4 sm:$0xff]   ;;  %v1175_v6 = vld [vmem:[#allocation5 + $0x20] ss:$8 sps:$4 sm:$0xff]   ;;  %v1176_v7 = vld [vmem:[#allocation5 + $0x34] ss:$8 sps:$4 sm:$0xff]  }
  0x5d   :  { %188 = vmatprep.subr.bf16.mxu0 %v1170_v3  ;;  %v1178_v8 = vld [vmem:[#allocation5 + $0x30] ss:$8 sps:$4 sm:$0xff]   ;;  %v1179_v9 = vld [vmem:[#allocation5 + $0x44] ss:$8 sps:$4 sm:$0xff]   ;;  %v1193_v11 = vld [vmem:[#allocation7] ss:$8 sps:$4 sm:$0xff]  }
  0x5e   :  { %v1191_v10 = vld [vmem:[#allocation7 + $0x4] ss:$8 sps:$4 sm:$0xff]   ;;  %v1194_v12 = vld [vmem:[#allocation7 + $0x14] ss:$8 sps:$4 sm:$0xff]   ;;  %v1181_v13 = vld [vmem:[#allocation5 + $0x40] ss:$8 sps:$4 sm:$0xff]  }
  0x5f   :  { %465 = vmatprep.subr.bf16.mxu1 %v1191_v10  ;;  %v1196_v14 = vld [vmem:[#allocation7 + $0x10] ss:$8 sps:$4 sm:$0xff]   ;;  %v1197_v15 = vld [vmem:[#allocation7 + $0x24] ss:$8 sps:$4 sm:$0xff]   ;;  %v1182_v16 = vld [vmem:[#allocation5 + $0x54] ss:$8 sps:$4 sm:$0xff]  }
  0x60   :  { %189 = vmatpush1.bf16.msra.mxu0 %v1172_v4  ;;  %466 = vmatpush1.bf16.msra.mxu1 %v1193_v11  ;;  %v1184_v17 = vld [vmem:[#allocation5 + $0x50] ss:$8 sps:$4 sm:$0xff]   ;;  %v1185_v18 = vld [vmem:[#allocation5 + $0x64] ss:$8 sps:$4 sm:$0xff]   ;;  %v1199_v19 = vld [vmem:[#allocation7 + $0x20] ss:$8 sps:$4 sm:$0xff]  }
  0x61   :  { %190 = vmatprep.subr.bf16.mxu0 %v1173_v5  ;;  %467 = vmatprep.subr.bf16.mxu1 %v1194_v12  ;;  %v1200_v20 = vld [vmem:[#allocation7 + $0x34] ss:$8 sps:$4 sm:$0xff]   ;;  %v1202_v21 = vld [vmem:[#allocation7 + $0x30] ss:$8 sps:$4 sm:$0xff]   ;;  %v1187_v22 = vld [vmem:[#allocation5 + $0x60] ss:$8 sps:$4 sm:$0xff]  }
  0x62   :  { %v1203_v23 = vld [vmem:[#allocation7 + $0x44] ss:$8 sps:$4 sm:$0xff]   ;;  %v1188_v24 = vld [vmem:[#allocation5 + $0x74] ss:$8 sps:$4 sm:$0xff]   ;;  %v1205_v25 = vld [vmem:[#allocation7 + $0x40] ss:$8 sps:$4 sm:$0xff]  }
  0x63   :  { %v1190_v26 = vld [vmem:[#allocation5 + $0x70] ss:$8 sps:$4 sm:$0xff]   ;;  %v1206_v28 = vld [vmem:[#allocation7 + $0x54] ss:$8 sps:$4 sm:$0xff]   ;;  %v1209_v31 = vld [vmem:[#allocation7 + $0x64] ss:$8 sps:$4 sm:$0xff]  }
  0x64   :  { %191 = vmatpush1.bf16.msra.mxu0 %v1175_v6  ;;  %468 = vmatpush1.bf16.msra.mxu1 %v1196_v14  ;;  %v1208_v29 = vld [vmem:[#allocation7 + $0x50] ss:$8 sps:$4 sm:$0xff]   ;;  %v1211_v32 = vld [vmem:[#allocation7 + $0x60] ss:$8 sps:$4 sm:$0xff]   ;;  %v1212_v33 = vld [vmem:[#allocation7 + $0x74] ss:$8 sps:$4 sm:$0xff]  }
  0x65   :  { %192 = vmatprep.subr.bf16.mxu0 %v1176_v7  ;;  %469 = vmatprep.subr.bf16.mxu1 %v1197_v15  ;;  %v1214_v34 = vld [vmem:[#allocation7 + $0x70] ss:$8 sps:$4 sm:$0xff]   ;;  %v1215_v35 = vld [vmem:[#allocation7 + $0x84] ss:$8 sps:$4 sm:$0xff]   ;;  %v1217_v36 = vld [vmem:[#allocation7 + $0x80] ss:$8 sps:$4 sm:$0xff]  }
  0x66   :  { %v1218_v37 = vld [vmem:[#allocation7 + $0x94] ss:$8 sps:$4 sm:$0xff]   ;;  %v1220_v38 = vld [vmem:[#allocation7 + $0x90] ss:$8 sps:$4 sm:$0xff]   ;;  %v1221_v39 = vld [vmem:[#allocation7 + $0xa4] ss:$8 sps:$4 sm:$0xff]  }
  0x67   :  { %v1223_v40 = vld [vmem:[#allocation7 + $0xa0] ss:$8 sps:$4 sm:$0xff]   ;;  %v1224_v41 = vld [vmem:[#allocation7 + $0xb4] ss:$8 sps:$4 sm:$0xff]   ;;  %v1226_v42 = vld [vmem:[#allocation7 + $0xb0] ss:$8 sps:$4 sm:$0xff]  }
  0x68   :  { %193 = vmatpush1.bf16.msra.mxu0 %v1178_v8  ;;  %470 = vmatpush1.bf16.msra.mxu1 %v1199_v19  ;;  %v1227_v43 = vld [vmem:[#allocation7 + $0xc4] ss:$8 sps:$4 sm:$0xff]   ;;  %v1229_v44 = vld [vmem:[#allocation7 + $0xc0] ss:$8 sps:$4 sm:$0xff]   ;;  %v1230_v45 = vld [vmem:[#allocation7 + $0xd4] ss:$8 sps:$4 sm:$0xff]  }
  0x69   :  { %194 = vmatprep.subr.bf16.mxu0 %v1179_v9  ;;  %471 = vmatprep.subr.bf16.mxu1 %v1200_v20  ;;  %v1232_v46 = vld [vmem:[#allocation7 + $0xd0] ss:$8 sps:$4 sm:$0xff]   ;;  %v1233_v47 = vld [vmem:[#allocation7 + $0xe4] ss:$8 sps:$4 sm:$0xff]   ;;  %v1235_v48 = vld [vmem:[#allocation7 + $0xe0] ss:$8 sps:$4 sm:$0xff]  }
  0x6a   :  { %v1236_v49 = vld [vmem:[#allocation7 + $0xf4] ss:$8 sps:$4 sm:$0xff]   ;;  %v1238_v50 = vld [vmem:[#allocation7 + $0xf0] ss:$8 sps:$4 sm:$0xff]   ;;  %v1239_v51 = vld [vmem:[#allocation8] ss:$8 sps:$4 sm:$0xff]  }
  0x6b   :  { %v1241_v52 = vld [vmem:[#allocation8 + $0x4] ss:$8 sps:$4 sm:$0xff]   ;;  %v1244_v53 = vld [vmem:[#allocation8 + $0x14] ss:$8 sps:$4 sm:$0xff]   ;;  %v1242_v54 = vld [vmem:[#allocation8 + $0x10] ss:$8 sps:$4 sm:$0xff]  }
  0x6c   :  { %195 = vmatpush1.bf16.msra.mxu0 %v1181_v13  ;;  %472 = vmatpush1.bf16.msra.mxu1 %v1202_v21  ;;  %v1247_v55 = vld [vmem:[#allocation8 + $0x24] ss:$8 sps:$4 sm:$0xff]   ;;  %v1245_v56 = vld [vmem:[#allocation8 + $0x20] ss:$8 sps:$4 sm:$0xff]   ;;  %v1250_v57 = vld [vmem:[#allocation8 + $0x34] ss:$8 sps:$4 sm:$0xff]  }
  0x6d   :  { %196 = vmatprep.subr.bf16.mxu0 %v1182_v16  ;;  %473 = vmatprep.subr.bf16.mxu1 %v1203_v23  ;;  %v1248_v58 = vld [vmem:[#allocation8 + $0x30] ss:$8 sps:$4 sm:$0xff]   ;;  %v1253_v59 = vld [vmem:[#allocation8 + $0x44] ss:$8 sps:$4 sm:$0xff]   ;;  %v1251_v60 = vld [vmem:[#allocation8 + $0x40] ss:$8 sps:$4 sm:$0xff]  }
  0x6e   :  { %v1256_v61 = vld [vmem:[#allocation8 + $0x54] ss:$8 sps:$4 sm:$0xff]   ;;  %v1254_v62 = vld [vmem:[#allocation8 + $0x50] ss:$8 sps:$4 sm:$0xff]   ;;  %s1467_s4 = smov [#allocation11]  }
  0x6f   :  { %s1027_s27 = sshll.u32 %s1467_s4, 4  ;;  %s1028_s27 = int_to_ptr.vmem [resolvable:$true] %s1027_s27 }
  0x70   :  { %197 = vmatpush1.bf16.msra.mxu0 %v1184_v17  ;;  %474 = vmatpush1.bf16.msra.mxu1 %v1205_v25  ;;  %s1427_s3 = scalar_lea.vmem %s1028_s27, 128  ;;  %p1432_p13 = scmp.lt.s32.totalorder %s1028_s27, %s1028_s27 }
  0x71   :  { %198 = vmatprep.subr.bf16.mxu0 %v1185_v18  ;;  %475 = vmatprep.subr.bf16.mxu1 %v1206_v28  ;;  %p1428_p12 = scmp.ne.s32.totalorder %s1028_s27, %s1427_s3  ;;  %p1433_p0 = scmp.lt.s32.totalorder %s1427_s3, %s1427_s3 }
  0x73   :  { %p1434_p1 = por %p1433_p0, %p1432_p13 }
  0x74   :  { %199 = vmatpush1.bf16.msra.mxu0 %v1187_v22  ;;  %476 = vmatpush1.bf16.msra.mxu1 %v1208_v29 }
  0x75   :  { %200 = vmatprep.subr.bf16.mxu0 %v1188_v24  ;;  %477 = vmatprep.subr.bf16.mxu1 %v1209_v31  ;;  %p1435_p2 = pnand %p1434_p1, %p1428_p12 }
  0x78   :  { %201 = vmatpush1.bf16.msra.mxu0 %v1190_v26  ;;  %478 = vmatpush1.bf16.msra.mxu1 %v1211_v32 }
  0x79   :  { %479 = vmatprep.subr.bf16.mxu1 %v1212_v33  ;;  %744 = vmatprep.subr.bf16.mxu0 %v1241_v52  ;;  %v1260_v52 = vld [vmem:[#allocation8 + $0x70] ss:$8 sps:$4 sm:$0xff]  }
  0x7b   :  { %219 = vmatmul.mubr.bf16.vlgmr.msra.gmra.mrb[0].mxu0 %v89_v30 }
  0x7c   :  { %480 = vmatpush1.bf16.msra.mxu1 %v1214_v34  ;;  %745 = vmatpush1.bf16.msra.mxu0 %v1239_v51  ;;  %v1262_v51 = vld [vmem:[#allocation8 + $0x74] ss:$8 sps:$4 sm:$0xff]  }
  0x7d   :  { %481 = vmatprep.subr.bf16.mxu1 %v1215_v35  ;;  %746 = vmatprep.subr.bf16.mxu0 %v1244_v53  ;;  %v1265_v53 = vld [vmem:[#allocation8 + $0x84] ss:$8 sps:$4 sm:$0xff]  }
  0x80   :  { %482 = vmatpush1.bf16.msra.mxu1 %v1217_v36  ;;  %747 = vmatpush1.bf16.msra.mxu0 %v1242_v54  ;;  %v1263_v54 = vld [vmem:[#allocation8 + $0x80] ss:$8 sps:$4 sm:$0xff]  }
  0x81   :  { %483 = vmatprep.subr.bf16.mxu1 %v1218_v37  ;;  %748 = vmatprep.subr.bf16.mxu0 %v1247_v55  ;;  %v1268_v55 = vld [vmem:[#allocation8 + $0x94] ss:$8 sps:$4 sm:$0xff]  }
  0x84   :  { %484 = vmatpush1.bf16.msra.mxu1 %v1220_v38  ;;  %749 = vmatpush1.bf16.msra.mxu0 %v1245_v56  ;;  %v1266_v56 = vld [vmem:[#allocation8 + $0x90] ss:$8 sps:$4 sm:$0xff]  }
  0x85   :  { %485 = vmatprep.subr.bf16.mxu1 %v1221_v39  ;;  %750 = vmatprep.subr.bf16.mxu0 %v1250_v57  ;;  %v1271_v57 = vld [vmem:[#allocation8 + $0xa4] ss:$8 sps:$4 sm:$0xff]  }
  0x88   :  { %486 = vmatpush1.bf16.msra.mxu1 %v1223_v40  ;;  %751 = vmatpush1.bf16.msra.mxu0 %v1248_v58  ;;  %v1269_v58 = vld [vmem:[#allocation8 + $0xa0] ss:$8 sps:$4 sm:$0xff]  }
  0x89   :  { %487 = vmatprep.subr.bf16.mxu1 %v1224_v41  ;;  %752 = vmatprep.subr.bf16.mxu0 %v1253_v59  ;;  %v1274_v59 = vld [vmem:[#allocation8 + $0xb4] ss:$8 sps:$4 sm:$0xff]  }
  0x8c   :  { %488 = vmatpush1.bf16.msra.mxu1 %v1226_v42  ;;  %753 = vmatpush1.bf16.msra.mxu0 %v1251_v60  ;;  %v1272_v60 = vld [vmem:[#allocation8 + $0xb0] ss:$8 sps:$4 sm:$0xff]  }
  0x8d   :  { %489 = vmatprep.subr.bf16.mxu1 %v1227_v43  ;;  %754 = vmatprep.subr.bf16.mxu0 %v1256_v61  ;;  %v1277_v61 = vld [vmem:[#allocation8 + $0xc4] ss:$8 sps:$4 sm:$0xff]  }
  0x90   :  { %490 = vmatpush1.bf16.msra.mxu1 %v1229_v44  ;;  %755 = vmatpush1.bf16.msra.mxu0 %v1254_v62  ;;  %v1275_v62 = vld [vmem:[#allocation8 + $0xc0] ss:$8 sps:$4 sm:$0xff]  }
  0x91   :  { %491 = vmatprep.subr.bf16.mxu1 %v1230_v45 }
  0x94   :  { %492 = vmatpush1.bf16.msra.mxu1 %v1232_v46 }
  0x95   :  { %493 = vmatprep.subr.bf16.mxu1 %v1233_v47 }
  0x98   :  { %494 = vmatpush1.bf16.msra.mxu1 %v1235_v48 }
  0x99   :  { %495 = vmatprep.subr.bf16.mxu1 %v1236_v49  ;;  %v1259_v49 = vld [vmem:[#allocation8 + $0x64] ss:$8 sps:$4 sm:$0xff]  }
  0x9a   :  { %756 = vmatprep.subr.bf16.mxu0 %v1259_v49 }
  0x9c   :  { %496 = vmatpush1.bf16.msra.mxu1 %v1238_v50  ;;  %v1257_v50 = vld [vmem:[#allocation8 + $0x60] ss:$8 sps:$4 sm:$0xff]  }
  0x9d   :  { %757 = vmatpush1.bf16.msra.mxu0 %v1257_v50 }
  0x9e   :  { %758 = vmatprep.subr.bf16.mxu0 %v1262_v51 }
  0xa1   :  { %759 = vmatpush1.bf16.msra.mxu0 %v1260_v52 }
  0xa2   :  { %760 = vmatprep.subr.bf16.mxu0 %v1265_v53 }
  0xa5   :  { %761 = vmatpush1.bf16.msra.mxu0 %v1263_v54 }
  0xa6   :  { %762 = vmatprep.subr.bf16.mxu0 %v1268_v55  ;;  %v1287_v55 = vld [vmem:[#allocation10 + $0x40] sm:$0xff]  }
  0xa7   :  { %1134 = vmatprep.subr.bf16.mxu1 %v1287_v55 }
  0xa9   :  { %763 = vmatpush1.bf16.msra.mxu0 %v1266_v56  ;;  %v1288_v56 = vld [vmem:[#allocation10] sm:$0xff]  }
  0xaa   :  { %764 = vmatprep.subr.bf16.mxu0 %v1271_v57  ;;  %v1289_v57 = vld [vmem:[#allocation10 + $0x48] sm:$0xff]  }
  0xad   :  { %765 = vmatpush1.bf16.msra.mxu0 %v1269_v58  ;;  %v1290_v58 = vld [vmem:[#allocation10 + $0x8] sm:$0xff]  }
  0xae   :  { %766 = vmatprep.subr.bf16.mxu0 %v1274_v59  ;;  %v1291_v59 = vld [vmem:[#allocation10 + $0x50] sm:$0xff]  }
  0xb1   :  { %767 = vmatpush1.bf16.msra.mxu0 %v1272_v60  ;;  %v1292_v60 = vld [vmem:[#allocation10 + $0x10] sm:$0xff]  }
  0xb2   :  { %768 = vmatprep.subr.bf16.mxu0 %v1277_v61  ;;  %v1293_v61 = vld [vmem:[#allocation10 + $0x58] sm:$0xff]  }
  0xb5   :  { %769 = vmatpush1.bf16.msra.mxu0 %v1275_v62  ;;  %v1294_v62 = vld [vmem:[#allocation10 + $0x18] sm:$0xff]  }
 0x14e   :  { %v220_v63 = vpop.f32.mrb[0].mxu0 }
 0x14f   :  { %v227_v0 = vrot.slane %v220_v63, 4  ;;  %v241_v1 = vmul.f32 %v220_v63, %v220_v63  ;;  %v222_v2 = vpop.f32.mrb[1].mxu0 }
 0x150   :  { %v233_v3 = vrot.slane %v222_v2, 4  ;;  %v242_v4 = vmul.f32 %v222_v2, %v222_v2  ;;  %v224_v5 = vpop.f32.mrb[2].mxu0 }
 0x151   :  { %v228_v6 = vadd.f32 %v227_v0, %v220_v63  ;;  %v243_v7 = vrot.slane %v241_v1, 4  ;;  %v225_v8 = vpop.f32.mrb[3].mxu0  ;;  %v1278_v0 = vld [vmem:[#allocation8 + $0xd0] ss:$8 sps:$4 sm:$0xff]  }
 0x152   :  { %v234_v9 = vadd.f32 %v233_v3, %v222_v2  ;;  %v249_v10 = vrot.slane %v242_v4, 4  ;;  %v1286_v3 = vld [vmem:[#allocation8 + $0xf4] ss:$8 sps:$4 sm:$0xff]  }
 0x153   :  { %v229_v11 = vrot.slane %v228_v6, 2  ;;  %v244_v12 = vadd.f32 %v243_v7, %v241_v1  ;;  %v1283_v1 = vld [vmem:[#allocation8 + $0xe4] ss:$8 sps:$4 sm:$0xff]  }
 0x154   :  { %v235_v13 = vrot.slane %v234_v9, 2  ;;  %v250_v14 = vadd.f32 %v249_v10, %v242_v4  ;;  %v1284_v4 = vld [vmem:[#allocation8 + $0xf0] ss:$8 sps:$4 sm:$0xff]  }
 0x155   :  { %v230_v15 = vadd.f32 %v229_v11, %v228_v6  ;;  %v245_v16 = vrot.slane %v244_v12, 2 }
 0x156   :  { %v251_v17 = vrot.slane %v250_v14, 2  ;;  %v236_v18 = vadd.f32 %v235_v13, %v234_v9 }
 0x157   :  { %v231_v19 = vrot.slane %v230_v15, 1  ;;  %v246_v20 = vadd.f32 %v245_v16, %v244_v12 }
 0x158   :  { %v252_v21 = vadd.f32 %v251_v17, %v250_v14  ;;  %v237_v22 = vrot.slane %v236_v18, 1 }
 0x159   :  { %v232_v23 = vadd.f32 %v231_v19, %v230_v15  ;;  %v247_v24 = vrot.slane %v246_v20, 1 }
 0x15a   :  { %v253_v25 = vrot.slane %v252_v21, 1  ;;  %v238_v26 = vadd.f32 %v237_v22, %v236_v18 }
 0x15b   :  { %v239_v27 = vmul.f32 0.125, %v232_v23  ;;  %v248_v28 = vadd.f32 %v247_v24, %v246_v20 }
 0x15c   :  { %v240_v29 = vmul.f32 0.125, %v238_v26  ;;  %v254_v30 = vadd.f32 %v253_v25, %v252_v21 }
 0x15d   :  { %v255_v31 = vmul.f32 0.125, %v248_v28  ;;  %v257_v32 = vmul.f32 %v239_v27, %v239_v27  ;;  %v261_v39 = vsub.f32 %v220_v63, %v239_v27  ;;  %v1280_v63 = vld [vmem:[#allocation8 + $0xd4] ss:$8 sps:$4 sm:$0xff]  }
 0x15e   :  { %v256_v33 = vmul.f32 0.125, %v254_v30  ;;  %v258_v34 = vmul.f32 %v240_v29, %v240_v29  ;;  %v262_v41 = vsub.f32 %v222_v2, %v240_v29  ;;  %770 = vmatprep.subr.bf16.mxu0 %v1280_v63  ;;  %v1281_v2 = vld [vmem:[#allocation8 + $0xe0] ss:$8 sps:$4 sm:$0xff]  }
 0x15f   :  { %v259_v35 = vsub.f32 %v255_v31, %v257_v32  ;;  %771 = vmatpush1.bf16.msra.mxu0 %v1278_v0  ;;  %v1295_v63 = vld [vmem:[#allocation10 + $0x60] sm:$0xff]  }
 0x160   :  { %v260_v36 = vsub.f32 %v256_v33, %v258_v34  ;;  %772 = vmatprep.subr.bf16.mxu0 %v1283_v1  ;;  %v1296_v0 = vld [vmem:[#allocation10 + $0x20] sm:$0xff]   ;;  %v1297_v1 = vld [vmem:[#allocation10 + $0x68] sm:$0xff]  }
 0x161   :  { %v263_v37 = vadd.f32 0.0001, %v259_v35 }
 0x162   :  { %v264_v38 = vadd.f32 0.0001, %v260_v36 }
 0x163   :  { %1303 = vrsqrt.f32 %v263_v37  ;;  %773 = vmatpush1.bf16.msra.mxu0 %v1281_v2  ;;  %v1298_v2 = vld [vmem:[#allocation10 + $0x28] sm:$0xff]  }
 0x164   :  { %1305 = vrsqrt.f32 %v264_v38  ;;  %774 = vmatprep.subr.bf16.mxu0 %v1286_v3  ;;  %v1299_v3 = vld [vmem:[#allocation10 + $0x70] sm:$0xff]  }
 0x167   :  { %775 = vmatpush1.bf16.msra.mxu0 %v1284_v4  ;;  %v1300_v4 = vld [vmem:[#allocation10 + $0x30] sm:$0xff]  }
 0x16d   :  { %v1304_v40 = vpop.eup %1303 }
 0x16e   :  { %v1306_v42 = vpop.eup %1305  ;;  %v267_v43 = vmul.f32 %v1304_v40, %v261_v39 }
 0x16f   :  { %v268_v44 = vmul.f32 %v1306_v42, %v262_v41 }
 0x170   :  { %v269_v45 = vmax.f32 %v267_v43, 0.0 }
 0x171   :  { %v270_v46 = vmax.f32 %v268_v44, 0.0 }
 0x172   :  { %v271_v48 = vpack.c.bf16 %v269_v45, %v269_v45 }
 0x173   :  { %v272_v47 = vpack.c.bf16 %v270_v46, %v270_v46 }
 0x175   :  { %497 = vmatprep.mubr.bf16.mxu1 %v272_v47 }
 0x176   :  { %498 = vmatmul.mubr.bf16.vlgmr.msra.gmra.mrb[0].mxu1 %v271_v48 }
 0x177   :  { %1135 = vmatpush3.bf16.msra.mxu1 %v1288_v56 }
 0x178   :  { %1136 = vmatprep.subr.bf16.mxu1 %v1289_v57 }
 0x17b   :  { %1137 = vmatpush3.bf16.msra.mxu1 %v1290_v58 }
 0x17c   :  { %1138 = vmatprep.subr.bf16.mxu1 %v1291_v59 }
 0x17f   :  { %1139 = vmatpush3.bf16.msra.mxu1 %v1292_v60 }
 0x180   :  { %1140 = vmatprep.subr.bf16.mxu1 %v1293_v61 }
 0x183   :  { %1141 = vmatpush3.bf16.msra.mxu1 %v1294_v62 }
 0x184   :  { %1142 = vmatprep.subr.bf16.mxu1 %v1295_v63 }
 0x187   :  { %1143 = vmatpush3.bf16.msra.mxu1 %v1296_v0 }
 0x188   :  { %1144 = vmatprep.subr.bf16.mxu1 %v1297_v1 }
 0x18b   :  { %1145 = vmatpush3.bf16.msra.mxu1 %v1298_v2 }
 0x18c   :  { %1146 = vmatprep.subr.bf16.mxu1 %v1299_v3 }
 0x18f   :  { %1147 = vmatpush3.bf16.msra.mxu1 %v1300_v4 }
 0x249   :  { %v499_v5 = vpop.f32.mrb[0].mxu1 }
 0x24a   :  { %v506_v6 = vrot.slane %v499_v5, 4  ;;  %v520_v7 = vmul.f32 %v499_v5, %v499_v5  ;;  %v501_v8 = vpop.f32.mrb[1].mxu1 }
 0x24b   :  { %v512_v9 = vrot.slane %v501_v8, 4  ;;  %v521_v10 = vmul.f32 %v501_v8, %v501_v8  ;;  %v503_v11 = vpop.f32.mrb[2].mxu1 }
 0x24c   :  { %v507_v12 = vadd.f32 %v506_v6, %v499_v5  ;;  %v522_v13 = vrot.slane %v520_v7, 4  ;;  %v504_v14 = vpop.f32.mrb[3].mxu1  ;;  %v1302_v6 = vld [vmem:[#allocation10 + $0x38] sm:$0xff]  }
 0x24d   :  { %v513_v15 = vadd.f32 %v512_v9, %v501_v8  ;;  %v528_v16 = vrot.slane %v521_v10, 4 }
 0x24e   :  { %v508_v17 = vrot.slane %v507_v12, 2  ;;  %v523_v18 = vadd.f32 %v522_v13, %v520_v7 }
 0x24f   :  { %v514_v19 = vrot.slane %v513_v15, 2  ;;  %v529_v20 = vadd.f32 %v528_v16, %v521_v10 }
 0x250   :  { %v509_v21 = vadd.f32 %v508_v17, %v507_v12  ;;  %v524_v22 = vrot.slane %v523_v18, 2 }
 0x251   :  { %v515_v23 = vadd.f32 %v514_v19, %v513_v15  ;;  %v530_v24 = vrot.slane %v529_v20, 2 }
 0x252   :  { %v510_v25 = vrot.slane %v509_v21, 1  ;;  %v525_v26 = vadd.f32 %v524_v22, %v523_v18 }
 0x253   :  { %v516_v27 = vrot.slane %v515_v23, 1  ;;  %v531_v28 = vadd.f32 %v530_v24, %v529_v20 }
 0x254   :  { %v511_v29 = vadd.f32 %v510_v25, %v509_v21  ;;  %v526_v30 = vrot.slane %v525_v26, 1 }
 0x255   :  { %v517_v31 = vadd.f32 %v516_v27, %v515_v23  ;;  %v532_v32 = vrot.slane %v531_v28, 1 }
 0x256   :  { %v518_v33 = vmul.f32 0.125, %v511_v29  ;;  %v527_v34 = vadd.f32 %v526_v30, %v525_v26 }
 0x257   :  { %v519_v35 = vmul.f32 0.125, %v517_v31  ;;  %v533_v36 = vadd.f32 %v532_v32, %v531_v28 }
 0x258   :  { %v534_v37 = vmul.f32 0.125, %v527_v34  ;;  %v536_v38 = vmul.f32 %v518_v33, %v518_v33  ;;  %v540_v45 = vsub.f32 %v499_v5, %v518_v33  ;;  %v1301_v5 = vld [vmem:[#allocation10 + $0x78] sm:$0xff]  }
 0x259   :  { %v535_v39 = vmul.f32 0.125, %v533_v36  ;;  %v537_v40 = vmul.f32 %v519_v35, %v519_v35  ;;  %v541_v47 = vsub.f32 %v501_v8, %v519_v35  ;;  %1148 = vmatprep.subr.bf16.mxu1 %v1301_v5 }
 0x25a   :  { %v538_v41 = vsub.f32 %v534_v37, %v536_v38  ;;  %1149 = vmatpush3.bf16.msra.mxu1 %v1302_v6 }
 0x25b   :  { %v539_v42 = vsub.f32 %v535_v39, %v537_v40 }
 0x25c   :  { %v542_v43 = vadd.f32 0.0001, %v538_v41 }
 0x25d   :  { %v543_v44 = vadd.f32 0.0001, %v539_v42 }
 0x25e   :  { %1307 = vrsqrt.f32 %v542_v43 }
 0x25f   :  { %1309 = vrsqrt.f32 %v543_v44 }
 0x268   :  { %v1308_v46 = vpop.eup %1307 }
 0x269   :  { %v1310_v48 = vpop.eup %1309  ;;  %v546_v49 = vmul.f32 %v1308_v46, %v540_v45 }
 0x26a   :  { %v547_v50 = vmul.f32 %v1310_v48, %v541_v47 }
 0x26b   :  { %v548_v51 = vmax.f32 %v546_v49, 0.0 }
 0x26c   :  { %v549_v52 = vmax.f32 %v547_v50, 0.0 }
 0x26d   :  { %v550_v54 = vpack.c.bf16 %v548_v51, %v548_v51 }
 0x26e   :  { %v551_v53 = vpack.c.bf16 %v549_v52, %v549_v52 }
 0x270   :  { %776 = vmatprep.mubr.bf16.mxu0 %v551_v53 }
 0x271   :  { %777 = vmatmul.mubr.bf16.vlgmr.msra.gmra.mrb[4].mxu0 %v550_v54 }
 0x344   :  { %v778_v7 = vpop.f32.mrb[4].mxu0 }
 0x345   :  { %v785_v8 = vrot.slane %v778_v7, 4  ;;  %v799_v9 = vmul.f32 %v778_v7, %v778_v7  ;;  %v780_v10 = vpop.f32.mrb[5].mxu0 }
 0x346   :  { %v791_v11 = vrot.slane %v780_v10, 4  ;;  %v800_v12 = vmul.f32 %v780_v10, %v780_v10  ;;  %v782_v13 = vpop.f32.mrb[6].mxu0 }
 0x347   :  { %v786_v14 = vadd.f32 %v785_v8, %v778_v7  ;;  %v801_v15 = vrot.slane %v799_v9, 4  ;;  %v783_v16 = vpop.f32.mrb[7].mxu0 }
 0x348   :  { %v792_v17 = vadd.f32 %v791_v11, %v780_v10  ;;  %v807_v18 = vrot.slane %v800_v12, 4 }
 0x349   :  { %v787_v19 = vrot.slane %v786_v14, 2  ;;  %v802_v20 = vadd.f32 %v801_v15, %v799_v9 }
 0x34a   :  { %v793_v21 = vrot.slane %v792_v17, 2  ;;  %v808_v22 = vadd.f32 %v807_v18, %v800_v12 }
 0x34b   :  { %v788_v23 = vadd.f32 %v787_v19, %v786_v14  ;;  %v803_v24 = vrot.slane %v802_v20, 2 }
 0x34c   :  { %v794_v25 = vadd.f32 %v793_v21, %v792_v17  ;;  %v809_v26 = vrot.slane %v808_v22, 2 }
 0x34d   :  { %v789_v27 = vrot.slane %v788_v23, 1  ;;  %v804_v28 = vadd.f32 %v803_v24, %v802_v20 }
 0x34e   :  { %v795_v29 = vrot.slane %v794_v25, 1  ;;  %v810_v30 = vadd.f32 %v809_v26, %v808_v22 }
 0x34f   :  { %v790_v31 = vadd.f32 %v789_v27, %v788_v23  ;;  %v805_v32 = vrot.slane %v804_v28, 1 }
 0x350   :  { %v796_v33 = vadd.f32 %v795_v29, %v794_v25  ;;  %v811_v34 = vrot.slane %v810_v30, 1 }
 0x351   :  { %v797_v35 = vmul.f32 0.125, %v790_v31  ;;  %v806_v36 = vadd.f32 %v805_v32, %v804_v28 }
 0x352   :  { %v798_v37 = vmul.f32 0.125, %v796_v33  ;;  %v812_v38 = vadd.f32 %v811_v34, %v810_v30 }
 0x353   :  { %v813_v39 = vmul.f32 0.125, %v806_v36  ;;  %v815_v40 = vmul.f32 %v797_v35, %v797_v35  ;;  %v819_v47 = vsub.f32 %v778_v7, %v797_v35 }
 0x354   :  { %v814_v41 = vmul.f32 0.125, %v812_v38  ;;  %v816_v42 = vmul.f32 %v798_v37, %v798_v37  ;;  %v820_v49 = vsub.f32 %v780_v10, %v798_v37 }
 0x355   :  { %v817_v43 = vsub.f32 %v813_v39, %v815_v40 }
 0x356   :  { %v818_v44 = vsub.f32 %v814_v41, %v816_v42 }
 0x357   :  { %v821_v45 = vadd.f32 0.0001, %v817_v43 }
 0x358   :  { %v822_v46 = vadd.f32 0.0001, %v818_v44 }
 0x359   :  { %1311 = vrsqrt.f32 %v821_v45 }
 0x35a   :  { %1313 = vrsqrt.f32 %v822_v46 }
 0x363   :  { %v1312_v48 = vpop.eup %1311 }
 0x364   :  { %v1314_v50 = vpop.eup %1313  ;;  %v825_v51 = vmul.f32 %v1312_v48, %v819_v47 }
 0x365   :  { %v826_v52 = vmul.f32 %v1314_v50, %v820_v49 }
 0x366   :  { %v827_v53 = vmax.f32 %v825_v51, 0.0 }
 0x367   :  { %v828_v54 = vmax.f32 %v826_v52, 0.0 }
 0x368   :  { %v829_v56 = vpack.c.bf16 %v827_v53, %v827_v53 }
 0x369   :  { %v830_v55 = vpack.c.bf16 %v828_v54, %v828_v54 }
 0x36b   :  { %991 = vmatprep.mubr.bf16.mxu1 %v830_v55 }
 0x36c   :  { %992 = vmatmul.mubr.bf16.vlgmr.msra.gmra.mrb[4].mxu1 %v829_v56 }
 0x43f   :  { %v1150_v57 = vpop.f32.mrb[4].mxu1 }
 0x440   :  { %v1151_v58 = vpop.f32.mrb[5].mxu1 }
 0x441   :  { %v1152_v59 = vadd.f32 %v1151_v58, %v1150_v57  ;;  %v1153_v60 = vpop.f32.mrb[6].mxu1 }
 0x442   :  { %v1154_v61 = vpop.f32.mrb[7].mxu1 }
 0x443   :  { %v999_v62 = vrot.slane %v1152_v59, 4  ;;  %v1006_v63 = vmul.f32 %v1152_v59, %v1152_v59 }
 0x445   :  { %v1000_v0 = vadd.f32 %v1152_v59, %v999_v62  ;;  %v1007_v1 = vrot.slane %v1006_v63, 4 }
 0x447   :  { %v1001_v2 = vrot.slane %v1000_v0, 2  ;;  %v1008_v3 = vadd.f32 %v1007_v1, %v1006_v63 }
 0x449   :  { %v1009_v4 = vrot.slane %v1008_v3, 2  ;;  %v1002_v5 = vadd.f32 %v1001_v2, %v1000_v0 }
 0x44b   :  { %v1010_v6 = vadd.f32 %v1009_v4, %v1008_v3  ;;  %v1003_v7 = vrot.slane %v1002_v5, 1 }
 0x44d   :  { %v1011_v8 = vrot.slane %v1010_v6, 1  ;;  %v1004_v9 = vadd.f32 %v1003_v7, %v1002_v5 }
 0x44f   :  { %v1005_v10 = vmul.f32 0.125, %v1004_v9  ;;  %v1012_v11 = vadd.f32 %v1011_v8, %v1010_v6 }
 0x451   :  { %v1013_v12 = vmul.f32 0.125, %v1012_v11  ;;  %v1014_v13 = vmul.f32 %v1005_v10, %v1005_v10  ;;  %v1016_v16 = vsub.f32 %v1152_v59, %v1005_v10 }
 0x453   :  { %v1015_v14 = vsub.f32 %v1013_v12, %v1014_v13 }
 0x455   :  { %v1017_v15 = vadd.f32 0.0001, %v1015_v14 }
 0x457   :  { %1315 = vrsqrt.f32 %v1017_v15 }
 0x461   :  { %v1316_v17 = vpop.eup %1315 }
 0x462   :  { %v1019_v18 = vmul.f32 %v1316_v17, %v1016_v16 }
 0x464   :  { %1020 = vst [vmem:[#allocation11] sm:$0xff] %v1019_v18 }
 0x465   :  { %1438 = shalt.err (!%p1435_p2)
}
 0x466   :  { %s1439_s7 = scalar_lea.hbm %s1584_s5, 128 }
 0x467   :  { %p1440_p3 = scmp.ne.s32.totalorder %s1584_s5, %s1439_s7  ;;  %p1443_p4 = scmp.lt.u32.totalorder %s1439_s7, %s1584_s5 }
 0x469   :  { %p1445_p5 = pnand %p1443_p4, %p1440_p3 }
 0x46b   :  { %1448 = shalt.err (!%p1445_p5)
}
 0x46c   :  { %1030 = dma.vmem_to_hbm [thread:$0]  %s1028_s27, 128, %s1584_s5, [#allocation4]  }
 0x46d   :  { %1455 = dma.done.wait [#allocation4], 128  }
 0x46e   :  { %1456 = vsyncadd [#allocation4], 4294967168 }
 0x46f   :  { %1034 = vsyncpa [#allocation3], 1 }
 0x470   :  { %1035 = vsyncpa [#allocation6], 1 }
 0x471   :  { %1036 = vsyncpa [#allocation9], 1 }
 0x472   :  { %1037 = vsyncpa [#allocation4], 1 }

</bundles_post_ra>
